<compile_context>
chip_gen: v6e
topology: v6e:2x2x1
jax: 0.10.0
libtpu: 0.0.40
codegen_flags: <defaults>
</compile_context>

<pallas_src>
import functools

import jax
import jax.numpy as jnp
from jax.experimental import pallas as pl
from jax.experimental.pallas import tpu as pltpu


# -----------------------------------------------------------------------------
# Kernel body
# -----------------------------------------------------------------------------
def _residual_block_kernel(n_hidden, compute_dtype, *refs):
    """refs = (x, [w_i, b_i] * n_hidden, w_out_fused, b_out_fused, out)."""
    x_ref = refs[0]
    h = x_ref[...].astype(compute_dtype)
    idx = 1
    # Hidden stack: Linear + ReLU (MXU matmul with f32 accumulation, VPU relu).
    for _ in range(n_hidden):
        w_ref, b_ref = refs[idx], refs[idx + 1]
        idx += 2
        acc = jnp.dot(h, w_ref[...], preferred_element_type=jnp.float32)
        acc = acc + b_ref[...]                       # f32 bias add
        h = jnp.maximum(acc, 0.0).astype(compute_dtype)
    # Fused output heads: a single lane-dense (block_b, P) matmul + store.
    w_out_ref, b_out_ref, out_ref = refs[idx], refs[idx + 1], refs[idx + 2]
    acc = jnp.dot(h, w_out_ref[...], preferred_element_type=jnp.float32)
    out_ref[...] = (acc + b_out_ref[...]).astype(out_ref.dtype)


# -----------------------------------------------------------------------------
# Helpers
# -----------------------------------------------------------------------------
def _round_up(x, m):
    return ((x + m - 1) // m) * m


@functools.lru_cache(maxsize=1)
def _tpu_hw_info():
    """(tensorcores_per_chip, vmem_capacity_bytes) with conservative fallbacks."""
    vmem_cap = 64 << 20  # v7x-safe default
    try:
        vmem_cap = int(pltpu.get_tpu_info().vmem_capacity_bytes)
    except Exception:
        pass
    num_tc = 1
    try:
        kind = jax.devices()[0].device_kind.lower()
        if "v7" in kind:
            num_tc = 2
    except Exception:
        pass
    return num_tc, vmem_cap


@functools.lru_cache(maxsize=1)
def _single_buffer_supported():
    """One-time capability probe for pipeline_mode=pl.Buffered(1).

    Compiles and runs a trivial kernel once; the real kernel is never wrapped
    in a broad try/except, so genuine lowering/VMEM errors still surface.
    """
    if not hasattr(pl, "Buffered"):
        return False

    def _probe(c_ref, x_ref, o_ref):
        o_ref[...] = x_ref[...] + c_ref[...]

    try:
        fn = pl.pallas_call(
            _probe,
            out_shape=jax.ShapeDtypeStruct((16, 128), jnp.float32),
            grid=(2,),
            in_specs=[
                pl.BlockSpec((8, 128), lambda i: (0, 0),
                             pipeline_mode=pl.Buffered(1)),
                pl.BlockSpec((8, 128), lambda i: (i, 0)),
            ],
            out_specs=pl.BlockSpec((8, 128), lambda i: (i, 0)),
        )
        jax.block_until_ready(fn(jnp.zeros((8, 128), jnp.float32),
                                 jnp.zeros((16, 128), jnp.float32)))
        return True
    except Exception:
        return False


def _pick_block_b(B, per_row_bytes, fixed_bytes, vmem_budget, num_tc,
                  row_target=1024):
    """Batch-tile rows: largest multiple of 8 that divides B and fits VMEM.

    Single-TC chips (v5e/v6e): biggest tile wins (grid may be 1).
    v7x (2 TCs): prefer a grid that is a multiple of num_tc with >= 2 steps per
    core so the parallel axis shards AND still pipelines; tiny batches use a
    single whole-batch tile on one core instead.
    """
    divisors = [d for d in range(8, B + 1, 8) if B % d == 0]
    if not divisors:
        return B  # tiny / non-multiple-of-8 batch: single whole-batch tile
    row_cap = max(8, (vmem_budget - fixed_bytes) // max(per_row_bytes, 1))
    row_cap = min(row_cap, row_target)
    fits = [d for d in divisors if d <= row_cap] or [divisors[0]]
    if num_tc >= 2:
        good = [d for d in fits
                if (B // d) % num_tc == 0 and (B // d) >= 2 * num_tc]
        if good:
            return max(good)
        if B <= row_cap:
            return B
    return max(fits)


# -----------------------------------------------------------------------------
# One-time parameter preparation (hoisted out of the per-call forward)
# -----------------------------------------------------------------------------
def prepare_params(params, compute_dtype=jnp.bfloat16):
    """Cast hidden weights to compute_dtype and build the fused, lane-padded
    output head.  Run ONCE; the result feeds the jit-able forward."""
    hidden, (wo1, bo1), (wo2, bo2) = params
    fc_size, inp_size = wo1.shape
    padded_out = _round_up(inp_size + 1, 128)

    w_out = jnp.zeros((fc_size, padded_out), jnp.float32)
    w_out = w_out.at[:, :inp_size].set(wo1.astype(jnp.float32))
    w_out = w_out.at[:, inp_size:inp_size + 1].set(wo2.astype(jnp.float32))
    b_out = jnp.zeros((1, padded_out), jnp.float32)
    b_out = b_out.at[:, :inp_size].set(bo1.astype(jnp.float32))
    b_out = b_out.at[:, inp_size:inp_size + 1].set(bo2.astype(jnp.float32))

    weights = tuple(w.astype(compute_dtype) for w, _ in hidden) \
        + (w_out.astype(compute_dtype),)
    biases = tuple(b.astype(jnp.float32) for _, b in hidden) + (b_out,)
    return (weights, biases)


# -----------------------------------------------------------------------------
# Forward (jit-friendly: all shape/dtype decisions are trace-time Python)
# -----------------------------------------------------------------------------
def residual_block_forward(x, prepared, *, block_b=None, out_dtype=None):
    """ResidualBlock forward as one pallas_call tiled over the batch dimension.

    x: (B, inp_size) activations.  prepared: output of prepare_params().
    Returns (x_bc: (B, inp_size), x_fc: (B, 1)).
    """
    weights, biases = prepared
    B, inp_size = x.shape
    n_hidden = len(weights) - 1
    fc_size = weights[-1].shape[0]
    padded_out = weights[-1].shape[1]
    compute_dtype = weights[0].dtype
    assert weights[0].shape[0] == inp_size
    if out_dtype is None:
        out_dtype = x.dtype   # set to jnp.bfloat16 if the consumer tolerates it

    num_tc, vmem_cap = _tpu_hw_info()
    single_buf = _single_buffer_supported()

    # VMEM accounting (bytes).
    x_isz = jnp.dtype(x.dtype).itemsize
    o_isz = jnp.dtype(out_dtype).itemsize
    weight_bytes = sum(int(w.size) * jnp.dtype(w.dtype).itemsize for w in weights)
    bias_bytes = sum(int(b.size) * jnp.dtype(b.dtype).itemsize for b in biases)
    wbuf = 1 if single_buf else 2
    fixed_bytes = wbuf * (weight_bytes + bias_bytes)
    # double-buffered x/out tiles + f32 live activations (with headroom)
    per_row = (2 * (inp_size * x_isz + padded_out * o_isz)
               + 4 * (inp_size + 2 * fc_size + padded_out))
    vmem_budget = int(vmem_cap * 0.85)

    if block_b is None:
        block_b = _pick_block_b(B, per_row, fixed_bytes, vmem_budget, num_tc)
    assert B % block_b == 0, (B, block_b)
    grid_steps = B // block_b
    semantics = ("parallel",) if grid_steps > 1 else ("arbitrary",)

    def const_spec(shape):
        # Grid-invariant block: single-buffer it in VMEM when supported.
        if single_buf:
            return pl.BlockSpec(shape, lambda i: (0, 0),
                                pipeline_mode=pl.Buffered(1))
        return pl.BlockSpec(shape, lambda i: (0, 0))

    in_specs = [pl.BlockSpec((block_b, inp_size), lambda i: (i, 0))]
    args = [x]
    for w, b in zip(weights, biases):
        in_specs += [const_spec(w.shape), const_spec(b.shape)]
        args += [w, b]
    out_specs = pl.BlockSpec((block_b, padded_out), lambda i: (i, 0))
    out_shape = jax.ShapeDtypeStruct((B, padded_out), out_dtype)

    need = fixed_bytes + block_b * per_row
    vmem_limit = max(32 << 20, min(int(1.3 * need) + (4 << 20), vmem_budget))

    flops = 2 * B * (inp_size * fc_size
                     + max(0, n_hidden - 1) * fc_size * fc_size
                     + fc_size * padded_out)
    bytes_accessed = (B * inp_size * x_isz + weight_bytes + bias_bytes
                      + B * padded_out * o_isz)

    kernel = functools.partial(_residual_block_kernel, n_hidden, compute_dtype)
    out = pl.pallas_call(
        kernel,
        out_shape=out_shape,
        grid_spec=pltpu.PrefetchScalarGridSpec(
            num_scalar_prefetch=0,
            grid=(grid_steps,),
            in_specs=in_specs,
            out_specs=out_specs,
        ),
        compiler_params=pltpu.CompilerParams(
            dimension_semantics=semantics,
            vmem_limit_bytes=int(vmem_limit),
        ),
        cost_estimate=pl.CostEstimate(
            flops=flops, transcendentals=0, bytes_accessed=bytes_accessed),
    )(*args)

    return out[:, :inp_size], out[:, inp_size:inp_size + 1]


# -----------------------------------------------------------------------------
# Parameter init (PyTorch-equivalent) and pure-JAX reference
# -----------------------------------------------------------------------------
def init_params(key, inp_size, n_fc, fc_size, dtype=jnp.float32):
    """PyTorch-style uniform(-1/sqrt(fan_in), 1/sqrt(fan_in)) init.

    Matches the module: self.layers = [Linear(inp,fc), ReLU]
      + [Linear(fc,fc), ReLU] * (n_fc - 3)   (i.e. range(1, n_fc-2))
    so n_hidden = 1 + max(0, n_fc - 3).  Weights are stored PRE-TRANSPOSED as
    (in_features, out_features) so y = x @ W + b == PyTorch's x @ W_pt.T + b.
    """
    n_hidden = 1 + max(0, n_fc - 3)
    hidden = []
    in_dim = inp_size
    for _ in range(n_hidden):
        key, kw, kb = jax.random.split(key, 3)
        bound = 1.0 / (in_dim ** 0.5)
        w = jax.random.uniform(kw, (in_dim, fc_size), dtype, -bound, bound)
        b = jax.random.uniform(kb, (1, fc_size), dtype, -bound, bound)
        hidden.append((w, b))
        in_dim = fc_size

    bound = 1.0 / (fc_size ** 0.5)
    key, k1, k2, k3, k4 = jax.random.split(key, 5)
    wo1 = jax.random.uniform(k1, (fc_size, inp_size), dtype, -bound, bound)
    bo1 = jax.random.uniform(k2, (1, inp_size), dtype, -bound, bound)
    wo2 = jax.random.uniform(k3, (fc_size, 1), dtype, -bound, bound)
    bo2 = jax.random.uniform(k4, (1, 1), dtype, -bound, bound)
    return hidden, (wo1, bo1), (wo2, bo2)


def reference_forward(x, params):
    """Pure-JAX reference identical to the PyTorch forward."""
    hidden, (wo1, bo1), (wo2, bo2) = params
    h = x
    for w, b in hidden:
        h = jnp.maximum(h @ w + b, 0.0)
    return h @ wo1 + bo1, h @ wo2 + bo2


# -----------------------------------------------------------------------------
# Demo / self-test
# -----------------------------------------------------------------------------
if __name__ == "__main__":
    # Small shapes consistent with the module: batch=256, inp=32, n_fc=4, fc=128.
    B, INP, N_FC, FC = 256, 32, 4, 128

    key = jax.random.PRNGKey(0)
    key, kx = jax.random.split(key)
    x = jax.random.normal(kx, (B, INP), jnp.float32)
    params = init_params(key, INP, N_FC, FC)
    ref_bc, ref_fc = reference_forward(x, params)

    fwd = jax.jit(residual_block_forward, static_argnames=("block_b", "out_dtype"))

    # Default fast path: bf16 matmul operands, f32 accumulation, f32 output.
    prep_bf16 = prepare_params(params)  # compute_dtype defaults to bfloat16
    out_bc, out_fc = jax.block_until_ready(fwd(x, prep_bf16))
    assert out_bc.shape == (B, INP) and out_fc.shape == (B, 1)
    assert jnp.allclose(out_bc, ref_bc, atol=1e-1, rtol=1e-1)
    assert jnp.allclose(out_fc, ref_fc, atol=1e-1, rtol=1e-1)

    # Reference-exact path: f32 matmul operands.
    prep_f32 = prepare_params(params, compute_dtype=jnp.float32)
    ex_bc, ex_fc = jax.block_until_ready(fwd(x, prep_f32))
    assert jnp.allclose(ex_bc, ref_bc, atol=1e-5, rtol=1e-5)
    assert jnp.allclose(ex_fc, ref_fc, atol=1e-5, rtol=1e-5)

    print("KERNEL_OK")
</pallas_src>

<mosaic_0001>
module attributes {stable_mosaic.version = 11 : i64} {
  func.func @_residual_block_kernel(%arg0: i32, %arg1: memref<256x32xf32, #tpu.memory_space<vmem>>, %arg2: memref<32x128xbf16, #tpu.memory_space<vmem>>, %arg3: memref<1x128xf32, #tpu.memory_space<vmem>>, %arg4: memref<128x128xbf16, #tpu.memory_space<vmem>>, %arg5: memref<1x128xf32, #tpu.memory_space<vmem>>, %arg6: memref<128x128xbf16, #tpu.memory_space<vmem>>, %arg7: memref<1x128xf32, #tpu.memory_space<vmem>>, %arg8: memref<256x128xf32, #tpu.memory_space<vmem>>) attributes {dimension_semantics = [#tpu.dimension_semantics<arbitrary>], iteration_bounds = array<i64: 1>, scalar_prefetch = 0 : i64, scratch_operands = 0 : i64, tpu.core_type = #tpu.core_type<tc>, window_params = [{transform_indices = @transform_0, window_bounds = array<i64: 256, 32>}, {pipeline_mode = #tpu.pipeline_mode<synchronous>, transform_indices = @transform_1, window_bounds = array<i64: 32, 128>}, {pipeline_mode = #tpu.pipeline_mode<synchronous>, transform_indices = @transform_2, window_bounds = array<i64: 1, 128>}, {pipeline_mode = #tpu.pipeline_mode<synchronous>, transform_indices = @transform_3, window_bounds = array<i64: 128, 128>}, {pipeline_mode = #tpu.pipeline_mode<synchronous>, transform_indices = @transform_4, window_bounds = array<i64: 1, 128>}, {pipeline_mode = #tpu.pipeline_mode<synchronous>, transform_indices = @transform_5, window_bounds = array<i64: 128, 128>}, {pipeline_mode = #tpu.pipeline_mode<synchronous>, transform_indices = @transform_6, window_bounds = array<i64: 1, 128>}, {transform_indices = @transform_7, window_bounds = array<i64: 256, 128>}]} {
    %c0 = arith.constant 0 : index
    %c0_0 = arith.constant 0 : index
    %0 = vector.load %arg1[%c0, %c0_0] : memref<256x32xf32, #tpu.memory_space<vmem>>, vector<256x32xf32>
    %1 = arith.truncf %0 : vector<256x32xf32> to vector<256x32xbf16>
    %c0_1 = arith.constant 0 : index
    %c0_2 = arith.constant 0 : index
    %2 = vector.load %arg2[%c0_1, %c0_2] : memref<32x128xbf16, #tpu.memory_space<vmem>>, vector<32x128xbf16>
    %cst = arith.constant dense<0.000000e+00> : vector<256x128xf32>
    %3 = tpu.matmul %1, %2, %cst {dimension_numbers = #tpu.dot_dimension_numbers<[1], [0], [0], [1], [0, 0, 1, 1], [], []>} : vector<256x32xbf16>, vector<32x128xbf16>, vector<256x128xf32> -> vector<256x128xf32>
    %c0_3 = arith.constant 0 : index
    %c0_4 = arith.constant 0 : index
    %4 = vector.load %arg3[%c0_3, %c0_4] : memref<1x128xf32, #tpu.memory_space<vmem>>, vector<1x128xf32>
    %5 = vector.broadcast %4 : vector<1x128xf32> to vector<256x128xf32>
    %6 = arith.addf %3, %5 : vector<256x128xf32>
    %cst_5 = arith.constant 0.000000e+00 : f32
    %7 = vector.broadcast %cst_5 : f32 to vector<256x128xf32>
    %8 = arith.maximumf %6, %7 : vector<256x128xf32>
    %9 = arith.truncf %8 : vector<256x128xf32> to vector<256x128xbf16>
    %c0_6 = arith.constant 0 : index
    %c0_7 = arith.constant 0 : index
    %10 = vector.load %arg4[%c0_6, %c0_7] : memref<128x128xbf16, #tpu.memory_space<vmem>>, vector<128x128xbf16>
    %cst_8 = arith.constant dense<0.000000e+00> : vector<256x128xf32>
    %11 = tpu.matmul %9, %10, %cst_8 {dimension_numbers = #tpu.dot_dimension_numbers<[1], [0], [0], [1], [0, 0, 1, 1], [], []>} : vector<256x128xbf16>, vector<128x128xbf16>, vector<256x128xf32> -> vector<256x128xf32>
    %c0_9 = arith.constant 0 : index
    %c0_10 = arith.constant 0 : index
    %12 = vector.load %arg5[%c0_9, %c0_10] : memref<1x128xf32, #tpu.memory_space<vmem>>, vector<1x128xf32>
    %13 = vector.broadcast %12 : vector<1x128xf32> to vector<256x128xf32>
    %14 = arith.addf %11, %13 : vector<256x128xf32>
    %cst_11 = arith.constant 0.000000e+00 : f32
    %15 = vector.broadcast %cst_11 : f32 to vector<256x128xf32>
    %16 = arith.maximumf %14, %15 : vector<256x128xf32>
    %17 = arith.truncf %16 : vector<256x128xf32> to vector<256x128xbf16>
    %c0_12 = arith.constant 0 : index
    %c0_13 = arith.constant 0 : index
    %18 = vector.load %arg6[%c0_12, %c0_13] : memref<128x128xbf16, #tpu.memory_space<vmem>>, vector<128x128xbf16>
    %cst_14 = arith.constant dense<0.000000e+00> : vector<256x128xf32>
    %19 = tpu.matmul %17, %18, %cst_14 {dimension_numbers = #tpu.dot_dimension_numbers<[1], [0], [0], [1], [0, 0, 1, 1], [], []>} : vector<256x128xbf16>, vector<128x128xbf16>, vector<256x128xf32> -> vector<256x128xf32>
    %c0_15 = arith.constant 0 : index
    %c0_16 = arith.constant 0 : index
    %20 = vector.load %arg7[%c0_15, %c0_16] : memref<1x128xf32, #tpu.memory_space<vmem>>, vector<1x128xf32>
    %21 = vector.broadcast %20 : vector<1x128xf32> to vector<256x128xf32>
    %22 = arith.addf %19, %21 : vector<256x128xf32>
    %c0_17 = arith.constant 0 : index
    %c0_18 = arith.constant 0 : index
    %23 = vector.load %arg8[%c0_17, %c0_18] : memref<256x128xf32, #tpu.memory_space<vmem>>, vector<256x128xf32>
    tpu.vector_store %arg8[%c0_17, %c0_18], %22 {strides = array<i32>} : memref<256x128xf32, #tpu.memory_space<vmem>>, vector<256x128xf32>,
    return
  }
  func.func @transform_0(%arg0: i32) -> (i32, i32) {
    %c0_i32 = arith.constant 0 : i32
    %c0_i32_0 = arith.constant 0 : i32
    return %arg0, %c0_i32 : i32, i32
  }
  func.func @transform_1(%arg0: i32) -> (i32, i32) {
    %c0_i32 = arith.constant 0 : i32
    %c0_i32_0 = arith.constant 0 : i32
    %c0_i32_1 = arith.constant 0 : i32
    return %c0_i32, %c0_i32_0 : i32, i32
  }
  func.func @transform_2(%arg0: i32) -> (i32, i32) {
    %c0_i32 = arith.constant 0 : i32
    %c0_i32_0 = arith.constant 0 : i32
    %c0_i32_1 = arith.constant 0 : i32
    return %c0_i32, %c0_i32_0 : i32, i32
  }
  func.func @transform_3(%arg0: i32) -> (i32, i32) {
    %c0_i32 = arith.constant 0 : i32
    %c0_i32_0 = arith.constant 0 : i32
    %c0_i32_1 = arith.constant 0 : i32
    return %c0_i32, %c0_i32_0 : i32, i32
  }
  func.func @transform_4(%arg0: i32) -> (i32, i32) {
    %c0_i32 = arith.constant 0 : i32
    %c0_i32_0 = arith.constant 0 : i32
    %c0_i32_1 = arith.constant 0 : i32
    return %c0_i32, %c0_i32_0 : i32, i32
  }
  func.func @transform_5(%arg0: i32) -> (i32, i32) {
    %c0_i32 = arith.constant 0 : i32
    %c0_i32_0 = arith.constant 0 : i32
    %c0_i32_1 = arith.constant 0 : i32
    return %c0_i32, %c0_i32_0 : i32, i32
  }
  func.func @transform_6(%arg0: i32) -> (i32, i32) {
    %c0_i32 = arith.constant 0 : i32
    %c0_i32_0 = arith.constant 0 : i32
    %c0_i32_1 = arith.constant 0 : i32
    return %c0_i32, %c0_i32_0 : i32, i32
  }
  func.func @transform_7(%arg0: i32) -> (i32, i32) {
    %c0_i32 = arith.constant 0 : i32
    %c0_i32_0 = arith.constant 0 : i32
    return %arg0, %c0_i32 : i32, i32
  }
}

</mosaic_0001>

<bundles_post_ra>
// kernel: residual_block_forward.1
= control target key start
LH: loop header
LB: loop body
LE: loop exit
PB: predicated region body
PF: predicated region fallthrough
CT: control target
= control target key end

     0   :  { %vm98_vm0 = vcmask 261120   ;;  %s1589_s1 = inlined_call_operand.vmem [shape: bf16[32,128], index: 1, kind: input, shape index: {}]   ;;  %s1590_s0 = inlined_call_operand.vmem [shape: f32[256,32], index: 0, kind: input, shape index: {}]   ;;  %s1591_s3 = inlined_call_operand.vmem [shape: bf16[128,128], index: 3, kind: input, shape index: {}]   ;;  %s1592_s5 = inlined_call_operand.vmem [shape: bf16[128,128], index: 5, kind: input, shape index: {}]   ;;  %s1593_s2 = inlined_call_operand.vmem [shape: f32[1,128], index: 2, kind: input, shape index: {}]   ;;  %s1594_s4 = inlined_call_operand.vmem [shape: f32[1,128], index: 4, kind: input, shape index: {}]   ;;  %s1595_s6 = inlined_call_operand.vmem [shape: f32[1,128], index: 6, kind: input, shape index: {}]   ;;  %s1596_s7 = inlined_call_operand.vmem [shape: f32[256,128], index: 7, kind: output, shape index: {}]  }
   0x1   :  { %v1143_v0 = vld [vmem:[%s1589_s1 + $0x8] sm:$0xff]   ;;  %v1144_v1 = vld [vmem:[%s1589_s1] sm:$0xff]   ;;  %v29_v5 = vld [vmem:[%s1590_s0 + $0x10] sm:$0xff] }
   0x2   :  { %1007 = vmatprep.subr.bf16.mxu0 %v1143_v0  ;;  %v27_v2 = vld [vmem:[%s1590_s0] sm:$0xff]  ;;  %v28_v3 = vld [vmem:[%s1590_s0 + $0x8] sm:$0xff]  ;;  %1139 = vmatprep.subr.bf16.mxu1 %v1143_v0  ;;  %v30_v6 = vld [vmem:[%s1590_s0 + $0x18] sm:$0xff] }
   0x3   :  { %1008 = vmatpush3.bf16.msra.mxu0 %v1143_v0  ;;  %v59_v4 = vpack.c.bf16 %v28_v3, %v27_v2  ;;  %1141 = vmatpush3.bf16.msra.mxu1 %v1143_v0  ;;  %v31_v7 = vld [vmem:[%s1590_s0 + $0x20] sm:$0xff]  ;;  %v32_v8 = vld [vmem:[%s1590_s0 + $0x28] sm:$0xff]  ;;  %v60_v9 = vpack.c.bf16 %v30_v6, %v29_v5  ;;  %v45_v14 = vld [vmem:[%s1590_s0 + $0x90] sm:$0xff] }
   0x4   :  { %1009 = vmatprep.subr.bf16.mxu0 %v1144_v1  ;;  %1140 = vmatprep.subr.bf16.mxu1 %v1144_v1  ;;  %v61_v10 = vpack.c.bf16 %v32_v8, %v31_v7  ;;  %v43_v11 = vld [vmem:[%s1590_s0 + $0x80] sm:$0xff]  ;;  %v44_v12 = vld [vmem:[%s1590_s0 + $0x88] sm:$0xff]  ;;  %v46_v15 = vld [vmem:[%s1590_s0 + $0x98] sm:$0xff] }
   0x5   :  { %1011 = vmatprep.mubr.msk.bf16.mxu0 %vm98_vm0, %v59_v4  ;;  %v67_v13 = vpack.c.bf16 %v44_v12, %v43_v11  ;;  %v47_v16 = vld [vmem:[%s1590_s0 + $0xa0] sm:$0xff]  ;;  %v68_v17 = vpack.c.bf16 %v46_v15, %v45_v14  ;;  %v48_v18 = vld [vmem:[%s1590_s0 + $0xa8] sm:$0xff]  ;;  %v33_v19 = vld [vmem:[%s1590_s0 + $0x30] sm:$0xff] }
   0x6   :  { %v34_v20 = vld [vmem:[%s1590_s0 + $0x38] sm:$0xff]  ;;  %v35_v21 = vld [vmem:[%s1590_s0 + $0x40] sm:$0xff]  ;;  %v69_v22 = vpack.c.bf16 %v48_v18, %v47_v16  ;;  %v36_v23 = vld [vmem:[%s1590_s0 + $0x48] sm:$0xff] }
   0x7   :  { %1010 = vmatpush3.bf16.msra.mxu0 %v1144_v1  ;;  %1142 = vmatpush3.bf16.msra.mxu1 %v1144_v1  ;;  %v49_v24 = vld [vmem:[%s1590_s0 + $0xb0] sm:$0xff]  ;;  %v50_v25 = vld [vmem:[%s1590_s0 + $0xb8] sm:$0xff]  ;;  %v51_v26 = vld [vmem:[%s1590_s0 + $0xc0] sm:$0xff]  ;;  %v62_v29 = vpack.c.bf16 %v34_v20, %v33_v19  ;;  %v63_v31 = vpack.c.bf16 %v36_v23, %v35_v21 }
   0x8   :  { %1027 = vmatprep.mubr.msk.bf16.mxu1 %vm98_vm0, %v67_v13  ;;  %v52_v27 = vld [vmem:[%s1590_s0 + $0xc8] sm:$0xff]  ;;  %v1145_v28 = vld [vmem:[%s1591_s3 + $0x38] sm:$0xff]   ;;  %v1146_v30 = vld [vmem:[%s1591_s3 + $0x30] sm:$0xff]   ;;  %v70_v32 = vpack.c.bf16 %v50_v25, %v49_v24 }
   0x9   :  { %1043 = vmatprep.subr.bf16.mxu1 %v1145_v28  ;;  %v71_v33 = vpack.c.bf16 %v52_v27, %v51_v26  ;;  %v37_v34 = vld [vmem:[%s1590_s0 + $0x50] sm:$0xff]  ;;  %v38_v35 = vld [vmem:[%s1590_s0 + $0x58] sm:$0xff]  ;;  %v1147_v36 = vld [vmem:[%s1591_s3 + $0x28] sm:$0xff]  }
   0xa   :  { %1012 = vmatmul.mubr.msk.bf16.vlgmr.msra.gmra.mxu0 %vm98_vm0, %v60_v9  ;;  %1028 = vmatmul.mubr.msk.bf16.vlgmr.msra.gmra.mxu1 %vm98_vm0, %v68_v17  ;;  %v39_v37 = vld [vmem:[%s1590_s0 + $0x60] sm:$0xff]  ;;  %v40_v38 = vld [vmem:[%s1590_s0 + $0x68] sm:$0xff]  ;;  %v53_v39 = vld [vmem:[%s1590_s0 + $0xd0] sm:$0xff]  ;;  %v64_v44 = vpack.c.bf16 %v38_v35, %v37_v34 }
   0xb   :  { %1015 = vmatprep.mubr.msk.bf16.mxu0 %vm98_vm0, %v61_v10  ;;  %1031 = vmatprep.mubr.msk.bf16.mxu1 %vm98_vm0, %v69_v22  ;;  %v54_v40 = vld [vmem:[%s1590_s0 + $0xd8] sm:$0xff]  ;;  %v55_v41 = vld [vmem:[%s1590_s0 + $0xe0] sm:$0xff]  ;;  %v56_v42 = vld [vmem:[%s1590_s0 + $0xe8] sm:$0xff]  ;;  %v65_v45 = vpack.c.bf16 %v40_v38, %v39_v37 }
   0xc   :  { %1044 = vmatpush3.bf16.msra.mxu1 %v1145_v28  ;;  %v1148_v43 = vld [vmem:[%s1591_s3 + $0x20] sm:$0xff]   ;;  %v72_v46 = vpack.c.bf16 %v54_v40, %v53_v39  ;;  %v73_v47 = vpack.c.bf16 %v56_v42, %v55_v41  ;;  %v1149_v48 = vld [vmem:[%s1591_s3 + $0x18] sm:$0xff]   ;;  %v41_v49 = vld [vmem:[%s1590_s0 + $0x70] sm:$0xff] }
   0xd   :  { %1045 = vmatprep.subr.bf16.mxu1 %v1146_v30  ;;  %v42_v50 = vld [vmem:[%s1590_s0 + $0x78] sm:$0xff]  ;;  %v57_v51 = vld [vmem:[%s1590_s0 + $0xf0] sm:$0xff]  ;;  %v1151_v56 = vld [vmem:[%s1591_s3 + $0x8] sm:$0xff]  }
   0xe   :  { %v58_v52 = vld [vmem:[%s1590_s0 + $0xf8] sm:$0xff]  ;;  %v66_v53 = vpack.c.bf16 %v42_v50, %v41_v49  ;;  %v1150_v55 = vld [vmem:[%s1591_s3 + $0x10] sm:$0xff]   ;;  %v1152_v57 = vld [vmem:[%s1591_s3] sm:$0xff]  }
   0xf   :  { %v74_v54 = vpack.c.bf16 %v58_v52, %v57_v51  ;;  %v1153_v58 = vld [vmem:[%s1592_s5 + $0x38] sm:$0xff]   ;;  %v1154_v59 = vld [vmem:[%s1592_s5 + $0x30] sm:$0xff]   ;;  %v1155_v60 = vld [vmem:[%s1592_s5 + $0x28] sm:$0xff]  }
  0x10   :  { %1046 = vmatpush3.bf16.msra.mxu1 %v1146_v30  ;;  %1091 = vmatprep.subr.bf16.mxu0 %v1153_v58  ;;  %v1156_v61 = vld [vmem:[%s1592_s5 + $0x20] sm:$0xff]   ;;  %v1157_v62 = vld [vmem:[%s1592_s5 + $0x18] sm:$0xff]  }
  0x11   :  { %1047 = vmatprep.subr.bf16.mxu1 %v1147_v36  ;;  %1092 = vmatpush3.bf16.msra.mxu0 %v1153_v58  ;;  %v1363_v2 = vld [vmem:[%s1593_s2] ss:$0 sm:$0xff] }
  0x12   :  { %1016 = vmatmul.mubr.msk.bf16.gmra.mxu0 %vm98_vm0, %v62_v29  ;;  %1032 = vmatmul.mubr.msk.bf16.gmra.mxu1 %vm98_vm0, %v70_v32 }
  0x13   :  { %1019 = vmatprep.mubr.msk.bf16.mxu0 %vm98_vm0, %v63_v31  ;;  %1035 = vmatprep.mubr.msk.bf16.mxu1 %vm98_vm0, %v71_v33 }
  0x14   :  { %1048 = vmatpush3.bf16.msra.mxu1 %v1147_v36  ;;  %1093 = vmatprep.subr.bf16.mxu0 %v1154_v59 }
  0x15   :  { %1049 = vmatprep.subr.bf16.mxu1 %v1148_v43  ;;  %1094 = vmatpush3.bf16.msra.mxu0 %v1154_v59 }
  0x16   :  { %1095 = vmatprep.subr.bf16.mxu0 %v1155_v60 }
  0x18   :  { %1050 = vmatpush3.bf16.msra.mxu1 %v1148_v43 }
  0x19   :  { %1051 = vmatprep.subr.bf16.mxu1 %v1149_v48  ;;  %1096 = vmatpush3.bf16.msra.mxu0 %v1155_v60 }
  0x1a   :  { %1020 = vmatmul.mubr.msk.bf16.gmra.mxu0 %vm98_vm0, %v64_v44  ;;  %1036 = vmatmul.mubr.msk.bf16.gmra.mxu1 %vm98_vm0, %v72_v46 }
  0x1b   :  { %1023 = vmatprep.mubr.msk.bf16.mxu0 %vm98_vm0, %v65_v45  ;;  %1039 = vmatprep.mubr.msk.bf16.mxu1 %vm98_vm0, %v73_v47 }
  0x1c   :  { %1052 = vmatpush3.bf16.msra.mxu1 %v1149_v48  ;;  %1097 = vmatprep.subr.bf16.mxu0 %v1156_v61 }
  0x1d   :  { %1053 = vmatprep.subr.bf16.mxu1 %v1150_v55  ;;  %1098 = vmatpush3.bf16.msra.mxu0 %v1156_v61 }
  0x1e   :  { %1099 = vmatprep.subr.bf16.mxu0 %v1157_v62 }
  0x20   :  { %1054 = vmatpush3.bf16.msra.mxu1 %v1150_v55 }
  0x21   :  { %1055 = vmatprep.subr.bf16.mxu1 %v1151_v56  ;;  %1100 = vmatpush3.bf16.msra.mxu0 %v1157_v62 }
  0x22   :  { %1024 = vmatmul.mubr.msk.bf16.gmra.mxu0 %vm98_vm0, %v66_v53  ;;  %1040 = vmatmul.mubr.msk.bf16.gmra.mxu1 %vm98_vm0, %v74_v54 }
  0x24   :  { %1056 = vmatpush3.bf16.msra.mxu1 %v1151_v56 }
  0x25   :  { %1057 = vmatprep.subr.bf16.mxu1 %v1152_v57 }
  0x28   :  { %1058 = vmatpush3.bf16.msra.mxu1 %v1152_v57 }
  0xca   :  { %v1013_v63 = vpop.f32.mrf.mxu0  ;;  %v1358_v0 = vpop.f32.mrf.mxu1 }
  0xcb   :  { %v190_v8 = vadd.f32 %v1013_v63, %v1363_v2 }
  0xcc   :  { %v181_v1 = vpop.f32.mrf.mxu0  ;;  %v245_v3 = vpop.f32.mrf.mxu1 }
  0xcd   :  { %v182_v5 = vadd.f32 %v1363_v2, %v181_v1  ;;  %v310_v17 = vmax.f32 %v190_v8, 0.0  ;;  %v246_v53 = vadd.f32 %v1363_v2, %v245_v3 }
  0xce   :  { %v1014_v4 = vpop.f32.mrf.mxu0  ;;  %v1367_v7 = vpop.f32.mrf.mxu1 }
  0xcf   :  { %v193_v6 = vadd.f32 %v1014_v4, %v1363_v2  ;;  %v308_v14 = vmax.f32 %v182_v5, 0.0  ;;  %v324_v62 = vmax.f32 %v246_v53, 0.0  ;;  %v1422_v53 = vld [vmem:[%s1594_s4] ss:$0 sm:$0xff] }
  0xd0   :  { %v184_v9 = vpop.f32.mrf.mxu0  ;;  %v248_v11 = vpop.f32.mrf.mxu1 }
  0xd1   :  { %v185_v10 = vadd.f32 %v1363_v2, %v184_v9  ;;  %v311_v12 = vmax.f32 %v193_v6, 0.0  ;;  %v249_v54 = vadd.f32 %v1363_v2, %v248_v11 }
  0xd2   :  { %v1017_v13 = vpop.f32.mrf.mxu0  ;;  %v1371_v16 = vpop.f32.mrf.mxu1 }
  0xd3   :  { %v309_v15 = vmax.f32 %v185_v10, 0.0  ;;  %v341_v21 = vpack.c.bf16 %v311_v12, %v310_v17  ;;  %v206_v26 = vadd.f32 %v1017_v13, %v1363_v2  ;;  %v325_v1 = vmax.f32 %v249_v54, 0.0 }
  0xd4   :  { %v197_v18 = vpop.f32.mrf.mxu0  ;;  %v261_v20 = vpop.f32.mrf.mxu1  ;;  %v254_v13 = vadd.f32 %v1358_v0, %v1363_v2  ;;  %v270_v0 = vadd.f32 %v1371_v16, %v1363_v2 }
  0xd5   :  { %v340_v19 = vpack.c.bf16 %v309_v15, %v308_v14  ;;  %v198_v23 = vadd.f32 %v1363_v2, %v197_v18  ;;  %v314_v34 = vmax.f32 %v206_v26, 0.0  ;;  %v348_v10 = vpack.c.bf16 %v325_v1, %v324_v62 }
  0xd6   :  { %v1018_v22 = vpop.f32.mrf.mxu0  ;;  %v1375_v25 = vpop.f32.mrf.mxu1  ;;  %v262_v11 = vadd.f32 %v1363_v2, %v261_v20  ;;  %v257_v15 = vadd.f32 %v1367_v7, %v1363_v2 }
  0xd7   :  { %v209_v24 = vadd.f32 %v1018_v22, %v1363_v2  ;;  %1059 = vmatprep.mubr.bf16.mxu1 %v340_v19  ;;  %v312_v32 = vmax.f32 %v198_v23, 0.0  ;;  %v273_v7 = vadd.f32 %v1375_v25, %v1363_v2 }
  0xd8   :  { %v200_v27 = vpop.f32.mrf.mxu0  ;;  %1060 = vmatmul.mubr.bf16.vlgmr.msra.gmra.mxu1 %v341_v21  ;;  %v264_v31 = vpop.f32.mrf.mxu1  ;;  %v328_v18 = vmax.f32 %v262_v11, 0.0  ;;  %v326_v21 = vmax.f32 %v254_v13, 0.0  ;;  %v327_v22 = vmax.f32 %v257_v15, 0.0 }
  0xd9   :  { %v201_v28 = vadd.f32 %v1363_v2, %v200_v27  ;;  %v315_v29 = vmax.f32 %v209_v24, 0.0  ;;  %v265_v12 = vadd.f32 %v1363_v2, %v264_v31  ;;  %v330_v31 = vmax.f32 %v270_v0, 0.0 }
  0xda   :  { %v1021_v30 = vpop.f32.mrf.mxu0  ;;  %v1379_v39 = vpop.f32.mrf.mxu1  ;;  %v349_v27 = vpack.c.bf16 %v327_v22, %v326_v21 }
  0xdb   :  { %v313_v33 = vmax.f32 %v201_v28, 0.0  ;;  %v343_v37 = vpack.c.bf16 %v315_v29, %v314_v34  ;;  %v222_v42 = vadd.f32 %v1021_v30, %v1363_v2  ;;  %v329_v19 = vmax.f32 %v265_v12, 0.0 }
  0xdc   :  { %v213_v35 = vpop.f32.mrf.mxu0  ;;  %v277_v47 = vpop.f32.mrf.mxu1  ;;  %v286_v16 = vadd.f32 %v1379_v39, %v1363_v2  ;;  %v1158_v39 = vld [vmem:[%s1592_s5 + $0x10] sm:$0xff]  }
  0xdd   :  { %v342_v36 = vpack.c.bf16 %v313_v33, %v312_v32  ;;  %v214_v40 = vadd.f32 %v1363_v2, %v213_v35  ;;  %v318_v50 = vmax.f32 %v222_v42, 0.0  ;;  %v350_v24 = vpack.c.bf16 %v329_v19, %v328_v18  ;;  %1101 = vmatprep.subr.bf16.mxu0 %v1158_v39 }
  0xde   :  { %v1022_v38 = vpop.f32.mrf.mxu0  ;;  %v1038_v57 = vpop.f32.mrf.mxu1  ;;  %v278_v20 = vadd.f32 %v1363_v2, %v277_v47  ;;  %v331_v32 = vmax.f32 %v273_v7, 0.0  ;;  %1102 = vmatpush3.bf16.msra.mxu0 %v1158_v39 }
  0xdf   :  { %v225_v41 = vadd.f32 %v1022_v38, %v1363_v2  ;;  %1063 = vmatprep.mubr.bf16.mxu1 %v342_v36  ;;  %v316_v48 = vmax.f32 %v214_v40, 0.0  ;;  %v289_v38 = vadd.f32 %v1038_v57, %v1363_v2 }
  0xe0   :  { %v216_v43 = vpop.f32.mrf.mxu0  ;;  %1064 = vmatmul.mubr.bf16.gmra.mxu1 %v343_v37  ;;  %v280_v3 = vpop.f32.mrf.mxu1  ;;  %v332_v29 = vmax.f32 %v278_v20, 0.0  ;;  %v351_v37 = vpack.c.bf16 %v331_v32, %v330_v31 }
  0xe1   :  { %v217_v44 = vadd.f32 %v1363_v2, %v216_v43  ;;  %v319_v45 = vmax.f32 %v225_v41, 0.0  ;;  %v281_v26 = vadd.f32 %v1363_v2, %v280_v3  ;;  %v334_v41 = vmax.f32 %v286_v16, 0.0 }
  0xe2   :  { %v1025_v46 = vpop.f32.mrf.mxu0  ;;  %v1041_v17 = vpop.f32.mrf.mxu1  ;;  %v335_v42 = vmax.f32 %v289_v38, 0.0 }
  0xe3   :  { %v317_v49 = vmax.f32 %v217_v44, 0.0  ;;  %v345_v55 = vpack.c.bf16 %v319_v45, %v318_v50  ;;  %v238_v60 = vadd.f32 %v1025_v46, %v1363_v2  ;;  %v333_v30 = vmax.f32 %v281_v26, 0.0  ;;  %v1159_v50 = vld [vmem:[%s1592_s5 + $0x8] sm:$0xff]  }
  0xe4   :  { %v229_v51 = vpop.f32.mrf.mxu0  ;;  %v293_v23 = vpop.f32.mrf.mxu1  ;;  %v353_v44 = vpack.c.bf16 %v335_v42, %v334_v41  ;;  %v302_v45 = vadd.f32 %v1041_v17, %v1363_v2  ;;  %1103 = vmatprep.subr.bf16.mxu0 %v1159_v50 }
  0xe5   :  { %v344_v52 = vpack.c.bf16 %v317_v49, %v316_v48  ;;  %v230_v58 = vadd.f32 %v1363_v2, %v229_v51  ;;  %v322_v8 = vmax.f32 %v238_v60, 0.0  ;;  %v352_v34 = vpack.c.bf16 %v333_v30, %v332_v29  ;;  %1104 = vmatpush3.bf16.msra.mxu0 %v1159_v50 }
  0xe6   :  { %v1026_v56 = vpop.f32.mrf.mxu0  ;;  %v1042_v28 = vpop.f32.mrf.mxu1  ;;  %v294_v35 = vadd.f32 %v1363_v2, %v293_v23  ;;  %v338_v47 = vmax.f32 %v302_v45, 0.0 }
  0xe7   :  { %v241_v59 = vadd.f32 %v1026_v56, %v1363_v2  ;;  %1067 = vmatprep.mubr.bf16.mxu1 %v344_v52  ;;  %v320_v5 = vmax.f32 %v230_v58, 0.0  ;;  %v305_v46 = vadd.f32 %v1042_v28, %v1363_v2 }
  0xe8   :  { %v232_v61 = vpop.f32.mrf.mxu0  ;;  %1068 = vmatmul.mubr.bf16.gmra.mxu1 %v345_v55  ;;  %v296_v33 = vpop.f32.mrf.mxu1  ;;  %v336_v25 = vmax.f32 %v294_v35, 0.0 }
  0xe9   :  { %v233_v63 = vadd.f32 %v1363_v2, %v232_v61  ;;  %v323_v4 = vmax.f32 %v241_v59, 0.0  ;;  %v297_v36 = vadd.f32 %v1363_v2, %v296_v33  ;;  %v339_v48 = vmax.f32 %v305_v46, 0.0  ;;  %v1160_v2 = vld [vmem:[%s1592_s5] sm:$0xff]  }
  0xea   :  { %1105 = vmatprep.subr.bf16.mxu0 %v1160_v2 }
  0xeb   :  { %v321_v6 = vmax.f32 %v233_v63, 0.0  ;;  %v347_v14 = vpack.c.bf16 %v323_v4, %v322_v8  ;;  %v337_v40 = vmax.f32 %v297_v36, 0.0  ;;  %v355_v49 = vpack.c.bf16 %v339_v48, %v338_v47  ;;  %1106 = vmatpush3.bf16.msra.mxu0 %v1160_v2 }
  0xed   :  { %v346_v9 = vpack.c.bf16 %v321_v6, %v320_v5  ;;  %v354_v43 = vpack.c.bf16 %v337_v40, %v336_v25 }
  0xef   :  { %1071 = vmatprep.mubr.bf16.mxu1 %v346_v9 }
  0xf0   :  { %1072 = vmatmul.mubr.bf16.gmra.mxu1 %v347_v14 }
  0xf1   :  { %1075 = vmatprep.mubr.bf16.mxu1 %v348_v10 }
  0xf8   :  { %1076 = vmatmul.mubr.bf16.gmra.mxu1 %v349_v27 }
  0xf9   :  { %1079 = vmatprep.mubr.bf16.mxu1 %v350_v24 }
 0x100   :  { %1080 = vmatmul.mubr.bf16.gmra.mxu1 %v351_v37 }
 0x101   :  { %1083 = vmatprep.mubr.bf16.mxu1 %v352_v34 }
 0x108   :  { %1084 = vmatmul.mubr.bf16.gmra.mxu1 %v353_v44 }
 0x109   :  { %1087 = vmatprep.mubr.bf16.mxu1 %v354_v43 }
 0x110   :  { %1088 = vmatmul.mubr.bf16.gmra.mxu1 %v355_v49 }
 0x198   :  { %v1061_v51 = vpop.f32.mrf.mxu1 }
 0x199   :  { %v470_v57 = vadd.f32 %v1061_v51, %v1422_v53 }
 0x19a   :  { %v461_v52 = vpop.f32.mrf.mxu1 }
 0x19b   :  { %v462_v55 = vadd.f32 %v1422_v53, %v461_v52  ;;  %v590_v1 = vmax.f32 %v470_v57, 0.0 }
 0x19c   :  { %v1062_v54 = vpop.f32.mrf.mxu1 }
 0x19d   :  { %v473_v56 = vadd.f32 %v1062_v54, %v1422_v53  ;;  %v588_v62 = vmax.f32 %v462_v55, 0.0 }
 0x19e   :  { %v464_v58 = vpop.f32.mrf.mxu1 }
 0x19f   :  { %v465_v59 = vadd.f32 %v1422_v53, %v464_v58  ;;  %v591_v60 = vmax.f32 %v473_v56, 0.0 }
 0x1a0   :  { %v1065_v61 = vpop.f32.mrf.mxu1 }
 0x1a1   :  { %v589_v63 = vmax.f32 %v465_v59, 0.0  ;;  %v621_v5 = vpack.c.bf16 %v591_v60, %v590_v1  ;;  %v486_v10 = vadd.f32 %v1065_v61, %v1422_v53 }
 0x1a2   :  { %v477_v4 = vpop.f32.mrf.mxu1 }
 0x1a3   :  { %v620_v3 = vpack.c.bf16 %v589_v63, %v588_v62  ;;  %v478_v8 = vadd.f32 %v1422_v53, %v477_v4  ;;  %v594_v18 = vmax.f32 %v486_v10, 0.0 }
 0x1a4   :  { %v1066_v6 = vpop.f32.mrf.mxu1 }
 0x1a5   :  { %v489_v9 = vadd.f32 %v1066_v6, %v1422_v53  ;;  %1107 = vmatprep.mubr.bf16.mxu0 %v620_v3  ;;  %v592_v15 = vmax.f32 %v478_v8, 0.0 }
 0x1a6   :  { %v480_v11 = vpop.f32.mrf.mxu1  ;;  %1108 = vmatmul.mubr.bf16.vlgmr.msra.gmra.mxu0 %v621_v5 }
 0x1a7   :  { %v481_v12 = vadd.f32 %v1422_v53, %v480_v11  ;;  %v595_v13 = vmax.f32 %v489_v9, 0.0 }
 0x1a8   :  { %v1069_v14 = vpop.f32.mrf.mxu1 }
 0x1a9   :  { %v593_v17 = vmax.f32 %v481_v12, 0.0  ;;  %v623_v22 = vpack.c.bf16 %v595_v13, %v594_v18  ;;  %v502_v26 = vadd.f32 %v1069_v14, %v1422_v53 }
 0x1aa   :  { %v493_v19 = vpop.f32.mrf.mxu1 }
 0x1ab   :  { %v622_v21 = vpack.c.bf16 %v593_v17, %v592_v15  ;;  %v494_v24 = vadd.f32 %v1422_v53, %v493_v19  ;;  %v598_v31 = vmax.f32 %v502_v26, 0.0 }
 0x1ac   :  { %v1070_v23 = vpop.f32.mrf.mxu1 }
 0x1ad   :  { %v505_v20 = vadd.f32 %v1070_v23, %v1422_v53  ;;  %1111 = vmatprep.mubr.bf16.mxu0 %v622_v21  ;;  %v596_v29 = vmax.f32 %v494_v24, 0.0 }
 0x1ae   :  { %v496_v27 = vpop.f32.mrf.mxu1  ;;  %1112 = vmatmul.mubr.bf16.gmra.mxu0 %v623_v22 }
 0x1af   :  { %v497_v0 = vadd.f32 %v1422_v53, %v496_v27  ;;  %v599_v7 = vmax.f32 %v505_v20, 0.0 }
 0x1b0   :  { %v1073_v28 = vpop.f32.mrf.mxu1 }
 0x1b1   :  { %v597_v30 = vmax.f32 %v497_v0, 0.0  ;;  %v625_v34 = vpack.c.bf16 %v599_v7, %v598_v31  ;;  %v518_v16 = vadd.f32 %v1073_v28, %v1422_v53 }
 0x1b2   :  { %v509_v32 = vpop.f32.mrf.mxu1 }
 0x1b3   :  { %v624_v33 = vpack.c.bf16 %v597_v30, %v596_v29  ;;  %v510_v36 = vadd.f32 %v1422_v53, %v509_v32  ;;  %v602_v44 = vmax.f32 %v518_v16, 0.0 }
 0x1b4   :  { %v1074_v35 = vpop.f32.mrf.mxu1 }
 0x1b5   :  { %v521_v37 = vadd.f32 %v1074_v35, %v1422_v53  ;;  %1115 = vmatprep.mubr.bf16.mxu0 %v624_v33  ;;  %v600_v42 = vmax.f32 %v510_v36, 0.0 }
 0x1b6   :  { %v512_v38 = vpop.f32.mrf.mxu1  ;;  %1116 = vmatmul.mubr.bf16.gmra.mxu0 %v625_v34 }
 0x1b7   :  { %v513_v25 = vadd.f32 %v1422_v53, %v512_v38  ;;  %v603_v40 = vmax.f32 %v521_v37, 0.0 }
 0x1b8   :  { %v1077_v41 = vpop.f32.mrf.mxu1 }
 0x1b9   :  { %v601_v43 = vmax.f32 %v513_v25, 0.0  ;;  %v627_v47 = vpack.c.bf16 %v603_v40, %v602_v44  ;;  %v534_v50 = vadd.f32 %v1077_v41, %v1422_v53  ;;  %v1459_v25 = vld [vmem:[%s1595_s6] ss:$0 sm:$0xff] }
 0x1ba   :  { %v525_v45 = vpop.f32.mrf.mxu1 }
 0x1bb   :  { %v626_v46 = vpack.c.bf16 %v601_v43, %v600_v42  ;;  %v526_v49 = vadd.f32 %v1422_v53, %v525_v45  ;;  %v606_v57 = vmax.f32 %v534_v50, 0.0 }
 0x1bc   :  { %v1078_v48 = vpop.f32.mrf.mxu1 }
 0x1bd   :  { %v537_v39 = vadd.f32 %v1078_v48, %v1422_v53  ;;  %1119 = vmatprep.mubr.bf16.mxu0 %v626_v46  ;;  %v604_v55 = vmax.f32 %v526_v49, 0.0 }
 0x1be   :  { %v528_v2 = vpop.f32.mrf.mxu1  ;;  %1120 = vmatmul.mubr.bf16.gmra.mxu0 %v627_v47 }
 0x1bf   :  { %v529_v51 = vadd.f32 %v1422_v53, %v528_v2  ;;  %v607_v52 = vmax.f32 %v537_v39, 0.0 }
 0x1c0   :  { %v1081_v54 = vpop.f32.mrf.mxu1 }
 0x1c1   :  { %v605_v56 = vmax.f32 %v529_v51, 0.0  ;;  %v629_v60 = vpack.c.bf16 %v607_v52, %v606_v57  ;;  %v550_v1 = vadd.f32 %v1081_v54, %v1422_v53 }
 0x1c2   :  { %v541_v58 = vpop.f32.mrf.mxu1 }
 0x1c3   :  { %v628_v59 = vpack.c.bf16 %v605_v56, %v604_v55  ;;  %v542_v62 = vadd.f32 %v1422_v53, %v541_v58  ;;  %v610_v10 = vmax.f32 %v550_v1, 0.0 }
 0x1c4   :  { %v1082_v61 = vpop.f32.mrf.mxu1 }
 0x1c5   :  { %v553_v63 = vadd.f32 %v1082_v61, %v1422_v53  ;;  %1123 = vmatprep.mubr.bf16.mxu0 %v628_v59  ;;  %v608_v8 = vmax.f32 %v542_v62, 0.0 }
 0x1c6   :  { %v544_v4 = vpop.f32.mrf.mxu1  ;;  %1124 = vmatmul.mubr.bf16.gmra.mxu0 %v629_v60 }
 0x1c7   :  { %v545_v3 = vadd.f32 %v1422_v53, %v544_v4  ;;  %v611_v5 = vmax.f32 %v553_v63, 0.0 }
 0x1c8   :  { %v1085_v6 = vpop.f32.mrf.mxu1 }
 0x1c9   :  { %v609_v9 = vmax.f32 %v545_v3, 0.0  ;;  %v631_v13 = vpack.c.bf16 %v611_v5, %v610_v10  ;;  %v566_v18 = vadd.f32 %v1085_v6, %v1422_v53 }
 0x1ca   :  { %v557_v11 = vpop.f32.mrf.mxu1 }
 0x1cb   :  { %v630_v12 = vpack.c.bf16 %v609_v9, %v608_v8  ;;  %v558_v15 = vadd.f32 %v1422_v53, %v557_v11  ;;  %v614_v26 = vmax.f32 %v566_v18, 0.0 }
 0x1cc   :  { %v1086_v14 = vpop.f32.mrf.mxu1 }
 0x1cd   :  { %v569_v17 = vadd.f32 %v1086_v14, %v1422_v53  ;;  %1127 = vmatprep.mubr.bf16.mxu0 %v630_v12  ;;  %v612_v24 = vmax.f32 %v558_v15, 0.0 }
 0x1ce   :  { %v560_v19 = vpop.f32.mrf.mxu1  ;;  %1128 = vmatmul.mubr.bf16.gmra.mxu0 %v631_v13 }
 0x1cf   :  { %v561_v21 = vadd.f32 %v1422_v53, %v560_v19  ;;  %v615_v22 = vmax.f32 %v569_v17, 0.0 }
 0x1d0   :  { %v1089_v23 = vpop.f32.mrf.mxu1 }
 0x1d1   :  { %v613_v20 = vmax.f32 %v561_v21, 0.0  ;;  %v633_v7 = vpack.c.bf16 %v615_v22, %v614_v26  ;;  %v582_v31 = vadd.f32 %v1089_v23, %v1422_v53 }
 0x1d2   :  { %v573_v27 = vpop.f32.mrf.mxu1 }
 0x1d3   :  { %v632_v0 = vpack.c.bf16 %v613_v20, %v612_v24  ;;  %v574_v29 = vadd.f32 %v1422_v53, %v573_v27  ;;  %v618_v37 = vmax.f32 %v582_v31, 0.0 }
 0x1d4   :  { %v1090_v28 = vpop.f32.mrf.mxu1 }
 0x1d5   :  { %v585_v30 = vadd.f32 %v1090_v28, %v1422_v53  ;;  %1131 = vmatprep.mubr.bf16.mxu0 %v632_v0  ;;  %v616_v35 = vmax.f32 %v574_v29, 0.0 }
 0x1d6   :  { %v576_v32 = vpop.f32.mrf.mxu1  ;;  %1132 = vmatmul.mubr.bf16.gmra.mxu0 %v633_v7 }
 0x1d7   :  { %v577_v33 = vadd.f32 %v1422_v53, %v576_v32  ;;  %v619_v34 = vmax.f32 %v585_v30, 0.0 }
 0x1d9   :  { %v617_v36 = vmax.f32 %v577_v33, 0.0  ;;  %v635_v38 = vpack.c.bf16 %v619_v34, %v618_v37 }
 0x1db   :  { %v634_v16 = vpack.c.bf16 %v617_v36, %v616_v35 }
 0x1dd   :  { %1135 = vmatprep.mubr.bf16.mxu0 %v634_v16 }
 0x1de   :  { %1136 = vmatmul.mubr.bf16.gmra.mxu0 %v635_v38 }
 0x266   :  { %v1109_v40 = vpop.f32.mrf.mxu0 }
 0x267   :  { %v750_v41 = vadd.f32 %v1109_v40, %v1459_v25 }
 0x268   :  { %v741_v42 = vpop.f32.mrf.mxu0 }
 0x269   :  { %870 = vst [vmem:[%s1596_s7 + $0x10] sm:$0xff] %v750_v41  ;;  %v742_v53 = vadd.f32 %v1459_v25, %v741_v42 }
 0x26a   :  { %v1110_v43 = vpop.f32.mrf.mxu0 }
 0x26b   :  { %868 = vst [vmem:[%s1596_s7] sm:$0xff] %v742_v53  ;;  %v753_v44 = vadd.f32 %v1110_v43, %v1459_v25 }
 0x26c   :  { %v744_v45 = vpop.f32.mrf.mxu0 }
 0x26d   :  { %871 = vst [vmem:[%s1596_s7 + $0x18] sm:$0xff] %v753_v44  ;;  %v745_v46 = vadd.f32 %v1459_v25, %v744_v45 }
 0x26e   :  { %v1113_v47 = vpop.f32.mrf.mxu0 }
 0x26f   :  { %869 = vst [vmem:[%s1596_s7 + $0x8] sm:$0xff] %v745_v46  ;;  %v766_v48 = vadd.f32 %v1113_v47, %v1459_v25 }
 0x270   :  { %v757_v49 = vpop.f32.mrf.mxu0 }
 0x271   :  { %874 = vst [vmem:[%s1596_s7 + $0x30] sm:$0xff] %v766_v48  ;;  %v758_v39 = vadd.f32 %v1459_v25, %v757_v49 }
 0x272   :  { %v1114_v50 = vpop.f32.mrf.mxu0 }
 0x273   :  { %872 = vst [vmem:[%s1596_s7 + $0x20] sm:$0xff] %v758_v39  ;;  %v769_v2 = vadd.f32 %v1114_v50, %v1459_v25 }
 0x274   :  { %v760_v51 = vpop.f32.mrf.mxu0 }
 0x275   :  { %875 = vst [vmem:[%s1596_s7 + $0x38] sm:$0xff] %v769_v2  ;;  %v761_v52 = vadd.f32 %v1459_v25, %v760_v51 }
 0x276   :  { %v1117_v54 = vpop.f32.mrf.mxu0 }
 0x277   :  { %873 = vst [vmem:[%s1596_s7 + $0x28] sm:$0xff] %v761_v52  ;;  %v782_v55 = vadd.f32 %v1117_v54, %v1459_v25 }
 0x278   :  { %v773_v56 = vpop.f32.mrf.mxu0 }
 0x279   :  { %878 = vst [vmem:[%s1596_s7 + $0x50] sm:$0xff] %v782_v55  ;;  %v774_v57 = vadd.f32 %v1459_v25, %v773_v56 }
 0x27a   :  { %v1118_v58 = vpop.f32.mrf.mxu0 }
 0x27b   :  { %876 = vst [vmem:[%s1596_s7 + $0x40] sm:$0xff] %v774_v57  ;;  %v785_v59 = vadd.f32 %v1118_v58, %v1459_v25 }
 0x27c   :  { %v776_v60 = vpop.f32.mrf.mxu0 }
 0x27d   :  { %879 = vst [vmem:[%s1596_s7 + $0x58] sm:$0xff] %v785_v59  ;;  %v777_v61 = vadd.f32 %v1459_v25, %v776_v60 }
 0x27e   :  { %v1121_v62 = vpop.f32.mrf.mxu0 }
 0x27f   :  { %877 = vst [vmem:[%s1596_s7 + $0x48] sm:$0xff] %v777_v61  ;;  %v798_v63 = vadd.f32 %v1121_v62, %v1459_v25 }
 0x280   :  { %v789_v1 = vpop.f32.mrf.mxu0 }
 0x281   :  { %882 = vst [vmem:[%s1596_s7 + $0x70] sm:$0xff] %v798_v63  ;;  %v790_v4 = vadd.f32 %v1459_v25, %v789_v1 }
 0x282   :  { %v1122_v3 = vpop.f32.mrf.mxu0 }
 0x283   :  { %880 = vst [vmem:[%s1596_s7 + $0x60] sm:$0xff] %v790_v4  ;;  %v801_v5 = vadd.f32 %v1122_v3, %v1459_v25 }
 0x284   :  { %v792_v6 = vpop.f32.mrf.mxu0 }
 0x285   :  { %883 = vst [vmem:[%s1596_s7 + $0x78] sm:$0xff] %v801_v5  ;;  %v793_v8 = vadd.f32 %v1459_v25, %v792_v6 }
 0x286   :  { %v1125_v9 = vpop.f32.mrf.mxu0 }
 0x287   :  { %881 = vst [vmem:[%s1596_s7 + $0x68] sm:$0xff] %v793_v8  ;;  %v814_v10 = vadd.f32 %v1125_v9, %v1459_v25 }
 0x288   :  { %v805_v11 = vpop.f32.mrf.mxu0 }
 0x289   :  { %886 = vst [vmem:[%s1596_s7 + $0x90] sm:$0xff] %v814_v10  ;;  %v806_v12 = vadd.f32 %v1459_v25, %v805_v11 }
 0x28a   :  { %v1126_v13 = vpop.f32.mrf.mxu0 }
 0x28b   :  { %884 = vst [vmem:[%s1596_s7 + $0x80] sm:$0xff] %v806_v12  ;;  %v817_v14 = vadd.f32 %v1126_v13, %v1459_v25 }
 0x28c   :  { %v808_v15 = vpop.f32.mrf.mxu0 }
 0x28d   :  { %887 = vst [vmem:[%s1596_s7 + $0x98] sm:$0xff] %v817_v14  ;;  %v809_v17 = vadd.f32 %v1459_v25, %v808_v15 }
 0x28e   :  { %v1129_v18 = vpop.f32.mrf.mxu0 }
 0x28f   :  { %885 = vst [vmem:[%s1596_s7 + $0x88] sm:$0xff] %v809_v17  ;;  %v830_v19 = vadd.f32 %v1129_v18, %v1459_v25 }
 0x290   :  { %v821_v21 = vpop.f32.mrf.mxu0 }
 0x291   :  { %890 = vst [vmem:[%s1596_s7 + $0xb0] sm:$0xff] %v830_v19  ;;  %v822_v22 = vadd.f32 %v1459_v25, %v821_v21 }
 0x292   :  { %v1130_v23 = vpop.f32.mrf.mxu0 }
 0x293   :  { %888 = vst [vmem:[%s1596_s7 + $0xa0] sm:$0xff] %v822_v22  ;;  %v833_v24 = vadd.f32 %v1130_v23, %v1459_v25 }
 0x294   :  { %v824_v20 = vpop.f32.mrf.mxu0 }
 0x295   :  { %891 = vst [vmem:[%s1596_s7 + $0xb8] sm:$0xff] %v833_v24  ;;  %v825_v26 = vadd.f32 %v1459_v25, %v824_v20 }
 0x296   :  { %v1133_v27 = vpop.f32.mrf.mxu0 }
 0x297   :  { %889 = vst [vmem:[%s1596_s7 + $0xa8] sm:$0xff] %v825_v26  ;;  %v846_v0 = vadd.f32 %v1133_v27, %v1459_v25 }
 0x298   :  { %v837_v7 = vpop.f32.mrf.mxu0 }
 0x299   :  { %894 = vst [vmem:[%s1596_s7 + $0xd0] sm:$0xff] %v846_v0  ;;  %v838_v28 = vadd.f32 %v1459_v25, %v837_v7 }
 0x29a   :  { %v1134_v29 = vpop.f32.mrf.mxu0 }
 0x29b   :  { %892 = vst [vmem:[%s1596_s7 + $0xc0] sm:$0xff] %v838_v28  ;;  %v849_v30 = vadd.f32 %v1134_v29, %v1459_v25 }
 0x29c   :  { %v840_v31 = vpop.f32.mrf.mxu0 }
 0x29d   :  { %895 = vst [vmem:[%s1596_s7 + $0xd8] sm:$0xff] %v849_v30  ;;  %v841_v32 = vadd.f32 %v1459_v25, %v840_v31 }
 0x29e   :  { %v1137_v33 = vpop.f32.mrf.mxu0 }
 0x29f   :  { %893 = vst [vmem:[%s1596_s7 + $0xc8] sm:$0xff] %v841_v32  ;;  %v862_v34 = vadd.f32 %v1137_v33, %v1459_v25 }
 0x2a0   :  { %v853_v35 = vpop.f32.mrf.mxu0 }
 0x2a1   :  { %898 = vst [vmem:[%s1596_s7 + $0xf0] sm:$0xff] %v862_v34  ;;  %v854_v36 = vadd.f32 %v1459_v25, %v853_v35 }
 0x2a2   :  { %v1138_v37 = vpop.f32.mrf.mxu0 }
 0x2a3   :  { %896 = vst [vmem:[%s1596_s7 + $0xe0] sm:$0xff] %v854_v36  ;;  %v865_v16 = vadd.f32 %v1138_v37, %v1459_v25 }
 0x2a4   :  { %v856_v38 = vpop.f32.mrf.mxu0 }
 0x2a5   :  { %899 = vst [vmem:[%s1596_s7 + $0xf8] sm:$0xff] %v865_v16  ;;  %v857_v40 = vadd.f32 %v1459_v25, %v856_v38 }
 0x2a7   :  { %897 = vst [vmem:[%s1596_s7 + $0xe8] sm:$0xff] %v857_v40 }

</bundles_post_ra>
